<compile_context>
chip_gen: v5e
topology: v5e:2x2
jax: 0.10.0
libtpu: 0.0.40
codegen_flags: <defaults>
</compile_context>

<pallas_src>
import functools

import jax
import jax.numpy as jnp
from jax.experimental import pallas as pl
from jax.experimental.pallas import tpu as pltpu


def detector_kernel(x_ref, w1_ref, b1_ref, w2_ref, b2_ref, o_ref,
                    *, use_bf16_matmul):
    x = x_ref[...]                                      # [TB, D]    f32
    w1 = w1_ref[...]                                    # [D, H]
    b1 = b1_ref[...]                                    # [1, H]
    w2 = w2_ref[...]                                    # [H, O_pad]
    b2 = b2_ref[...]                                    # [1, O_pad]

    if use_bf16_matmul:                                 # v5e/v6e MXU relief
        x = x.astype(jnp.bfloat16)
        w1 = w1.astype(jnp.bfloat16)

    # fc1 (MXU) + bias
    h = jnp.dot(x, w1, preferred_element_type=jnp.float32) + b1     # [TB, H]

    # ReLU_Poly activation (polynomial ReLU surrogate, see TODO above)
    z = h * h                                                        # [TB, H]

    if use_bf16_matmul:
        z = z.astype(jnp.bfloat16)
        w2 = w2.astype(jnp.bfloat16)

    # fc2 (MXU) + bias  (narrow, full-last-dim output block)
    out = jnp.dot(z, w2, preferred_element_type=jnp.float32) + b2    # [TB, O_pad]
    o_ref[...] = out.astype(o_ref.dtype)


def _round_up(x, m):
    return ((x + m - 1) // m) * m


def detector_forward(x, w1, b1, w2, b2, *, tb=8192, use_bf16_matmul=False):
    """x: [B, D] f32; w1: [D, 32]; b1: [1, 32]; w2: [32, 10]; b2: [1, 10]."""
    B, D = x.shape
    H = w1.shape[1]
    O = w2.shape[1]

    # Narrow output padding only (10 -> 16 columns); tiny wrapper cost.
    O_pad = _round_up(O, 8)
    if O_pad != O:
        w2p = jnp.zeros((H, O_pad), w2.dtype).at[:, :O].set(w2)
        b2p = jnp.zeros((1, O_pad), b2.dtype).at[:, :O].set(b2)
    else:
        w2p, b2p = w2, b2

    # Batch tile: sublane-aligned; ragged last grid block is store-masked by
    # Pallas, so no wrapper-side jnp.pad of x is needed.
    tb_eff = min(tb, _round_up(B, 8))
    n_tiles = pl.cdiv(B, tb_eff)

    bytes_accessed = 4 * (B * D + B * O_pad + D * H + H + H * O_pad + O_pad)
    cost = pl.CostEstimate(
        flops=2 * B * (D * H + H * O_pad),
        transcendentals=0,
        bytes_accessed=bytes_accessed,
    )

    kernel = functools.partial(detector_kernel, use_bf16_matmul=use_bf16_matmul)

    out = pl.pallas_call(
        kernel,
        out_shape=jax.ShapeDtypeStruct((B, O_pad), jnp.float32),
        grid_spec=pltpu.PrefetchScalarGridSpec(
            num_scalar_prefetch=0,
            grid=(n_tiles,),
            in_specs=[
                pl.BlockSpec((tb_eff, D), lambda i: (i, 0)),   # x streams
                pl.BlockSpec((D, H), lambda i: (0, 0)),        # weights resident
                pl.BlockSpec((1, H), lambda i: (0, 0)),        # (constant index
                pl.BlockSpec((H, O_pad), lambda i: (0, 0)),    #  map -> no re-DMA
                pl.BlockSpec((1, O_pad), lambda i: (0, 0)),    #  across steps)
            ],
            out_specs=pl.BlockSpec((tb_eff, O_pad), lambda i: (i, 0)),
        ),
        compiler_params=pltpu.CompilerParams(
            dimension_semantics=("parallel",),   # megacore sharding on v7x
        ),
        cost_estimate=cost,
    )(x, w1, b1, w2p, b2p)

    return out[:, :O] if O_pad != O else out


def _init_linear(key, fan_in, fan_out):
    # Deterministic init mimicking PyTorch nn.Linear default:
    # U(-1/sqrt(fan_in), 1/sqrt(fan_in)) for both weight and bias.
    kw, kb = jax.random.split(key)
    bound = 1.0 / (fan_in ** 0.5)
    w = jax.random.uniform(kw, (fan_in, fan_out), jnp.float32, -bound, bound)
    b = jax.random.uniform(kb, (1, fan_out), jnp.float32, -bound, bound)
    return w, b


def _reference(x, w1, b1, w2, b2, use_bf16_matmul=False):
    if use_bf16_matmul:
        h = jnp.dot(x.astype(jnp.bfloat16), w1.astype(jnp.bfloat16),
                    preferred_element_type=jnp.float32) + b1
        z = h * h
        return jnp.dot(z.astype(jnp.bfloat16), w2.astype(jnp.bfloat16),
                       preferred_element_type=jnp.float32) + b2
    h = jnp.dot(x, w1, precision=jax.lax.Precision.HIGHEST) + b1
    z = h * h
    return jnp.dot(z, w2, precision=jax.lax.Precision.HIGHEST) + b2


if __name__ == "__main__":
    key = jax.random.PRNGKey(0)
    k_x, k_fc1, k_fc2, k_big = jax.random.split(key, 4)

    B, D, H, O = 8, 64, 32, 10   # small shapes consistent with the module
    x = jax.random.normal(k_x, (B, D), jnp.float32)
    w1, b1 = _init_linear(k_fc1, D, H)
    w2, b2 = _init_linear(k_fc2, H, O)

    # 1) Small batch, single tile, f32 matmuls (default semantics).
    out = jax.block_until_ready(detector_forward(x, w1, b1, w2, b2))
    ref = _reference(x, w1, b1, w2, b2)
    assert out.shape == (B, O)
    assert jnp.allclose(out, ref, atol=2e-3, rtol=2e-3), "mismatch (small B)"

    # 2) Ragged multi-tile batch: 2500 rows, tb=512 -> 5 grid steps, last block
    #    partial (store-masked), no wrapper-side padding of x.
    B2 = 2500
    x2 = jax.random.normal(k_big, (B2, D), jnp.float32)
    out2 = jax.block_until_ready(detector_forward(x2, w1, b1, w2, b2, tb=512))
    ref2 = _reference(x2, w1, b1, w2, b2)
    assert out2.shape == (B2, O)
    assert jnp.allclose(out2, ref2, atol=2e-3, rtol=2e-3), "mismatch (tiled B)"

    # 3) bf16-operand matmul path (v5e/v6e recommendation); looser tolerance
    #    since the squaring activation amplifies bf16 rounding.
    out3 = jax.block_until_ready(
        detector_forward(x2, w1, b1, w2, b2, tb=512, use_bf16_matmul=True))
    ref3 = _reference(x2, w1, b1, w2, b2, use_bf16_matmul=True)
    assert out3.shape == (B2, O)
    assert jnp.allclose(out3, ref3, atol=2e-2, rtol=2e-2), "mismatch (bf16)"

    print("KERNEL_OK")
</pallas_src>

<mosaic_0001>
module attributes {stable_mosaic.version = 11 : i64} {
  func.func @detector_kernel(%arg0: i32, %arg1: memref<8x64xf32, #tpu.memory_space<vmem>>, %arg2: memref<64x32xf32, #tpu.memory_space<vmem>>, %arg3: memref<1x32xf32, #tpu.memory_space<vmem>>, %arg4: memref<32x16xf32, #tpu.memory_space<vmem>>, %arg5: memref<1x16xf32, #tpu.memory_space<vmem>>, %arg6: memref<8x16xf32, #tpu.memory_space<vmem>>) attributes {dimension_semantics = [#tpu.dimension_semantics<parallel>], iteration_bounds = array<i64: 1>, scalar_prefetch = 0 : i64, scratch_operands = 0 : i64, tpu.core_type = #tpu.core_type<tc>, window_params = [{transform_indices = @transform_0, window_bounds = array<i64: 8, 64>}, {pipeline_mode = #tpu.pipeline_mode<synchronous>, transform_indices = @transform_1, window_bounds = array<i64: 64, 32>}, {pipeline_mode = #tpu.pipeline_mode<synchronous>, transform_indices = @transform_2, window_bounds = array<i64: 1, 32>}, {pipeline_mode = #tpu.pipeline_mode<synchronous>, transform_indices = @transform_3, window_bounds = array<i64: 32, 16>}, {pipeline_mode = #tpu.pipeline_mode<synchronous>, transform_indices = @transform_4, window_bounds = array<i64: 1, 16>}, {transform_indices = @transform_5, window_bounds = array<i64: 8, 16>}]} {
    %c0 = arith.constant 0 : index
    %c0_0 = arith.constant 0 : index
    %0 = vector.load %arg1[%c0, %c0_0] : memref<8x64xf32, #tpu.memory_space<vmem>>, vector<8x64xf32>
    %c0_1 = arith.constant 0 : index
    %c0_2 = arith.constant 0 : index
    %1 = vector.load %arg2[%c0_1, %c0_2] : memref<64x32xf32, #tpu.memory_space<vmem>>, vector<64x32xf32>
    %c0_3 = arith.constant 0 : index
    %c0_4 = arith.constant 0 : index
    %2 = vector.load %arg3[%c0_3, %c0_4] : memref<1x32xf32, #tpu.memory_space<vmem>>, vector<1x32xf32>
    %c0_5 = arith.constant 0 : index
    %c0_6 = arith.constant 0 : index
    %3 = vector.load %arg4[%c0_5, %c0_6] : memref<32x16xf32, #tpu.memory_space<vmem>>, vector<32x16xf32>
    %c0_7 = arith.constant 0 : index
    %c0_8 = arith.constant 0 : index
    %4 = vector.load %arg5[%c0_7, %c0_8] : memref<1x16xf32, #tpu.memory_space<vmem>>, vector<1x16xf32>
    %cst = arith.constant dense<0.000000e+00> : vector<8x32xf32>
    %5 = tpu.matmul %0, %1, %cst {dimension_numbers = #tpu.dot_dimension_numbers<[1], [0], [0], [1], [0, 0, 1, 1], [], []>} : vector<8x64xf32>, vector<64x32xf32>, vector<8x32xf32> -> vector<8x32xf32>
    %6 = vector.broadcast %2 : vector<1x32xf32> to vector<8x32xf32>
    %7 = arith.addf %5, %6 : vector<8x32xf32>
    %8 = arith.mulf %7, %7 : vector<8x32xf32>
    %cst_9 = arith.constant dense<0.000000e+00> : vector<8x16xf32>
    %9 = tpu.matmul %8, %3, %cst_9 {dimension_numbers = #tpu.dot_dimension_numbers<[1], [0], [0], [1], [0, 0, 1, 1], [], []>} : vector<8x32xf32>, vector<32x16xf32>, vector<8x16xf32> -> vector<8x16xf32>
    %10 = vector.broadcast %4 : vector<1x16xf32> to vector<8x16xf32>
    %11 = arith.addf %9, %10 : vector<8x16xf32>
    %c0_10 = arith.constant 0 : index
    %c0_11 = arith.constant 0 : index
    %12 = vector.load %arg6[%c0_10, %c0_11] : memref<8x16xf32, #tpu.memory_space<vmem>>, vector<8x16xf32>
    tpu.vector_store %arg6[%c0_10, %c0_11], %11 {strides = array<i32>} : memref<8x16xf32, #tpu.memory_space<vmem>>, vector<8x16xf32>,
    return
  }
  func.func @transform_0(%arg0: i32) -> (i32, i32) {
    %c0_i32 = arith.constant 0 : i32
    %c0_i32_0 = arith.constant 0 : i32
    return %arg0, %c0_i32 : i32, i32
  }
  func.func @transform_1(%arg0: i32) -> (i32, i32) {
    %c0_i32 = arith.constant 0 : i32
    %c0_i32_0 = arith.constant 0 : i32
    %c0_i32_1 = arith.constant 0 : i32
    return %c0_i32, %c0_i32_0 : i32, i32
  }
  func.func @transform_2(%arg0: i32) -> (i32, i32) {
    %c0_i32 = arith.constant 0 : i32
    %c0_i32_0 = arith.constant 0 : i32
    %c0_i32_1 = arith.constant 0 : i32
    return %c0_i32, %c0_i32_0 : i32, i32
  }
  func.func @transform_3(%arg0: i32) -> (i32, i32) {
    %c0_i32 = arith.constant 0 : i32
    %c0_i32_0 = arith.constant 0 : i32
    %c0_i32_1 = arith.constant 0 : i32
    return %c0_i32, %c0_i32_0 : i32, i32
  }
  func.func @transform_4(%arg0: i32) -> (i32, i32) {
    %c0_i32 = arith.constant 0 : i32
    %c0_i32_0 = arith.constant 0 : i32
    %c0_i32_1 = arith.constant 0 : i32
    return %c0_i32, %c0_i32_0 : i32, i32
  }
  func.func @transform_5(%arg0: i32) -> (i32, i32) {
    %c0_i32 = arith.constant 0 : i32
    %c0_i32_0 = arith.constant 0 : i32
    return %arg0, %c0_i32 : i32, i32
  }
}

</mosaic_0001>

<bundles_post_ra>
// kernel: tpu_custom_call.1
= control target key start
LH: loop header
LB: loop body
LE: loop exit
PB: predicated region body
PF: predicated region fallthrough
CT: control target
= control target key end

     0   :  { %s219_s0 = inlined_call_operand.vmem [shape: f32[8,64], index: 0, kind: input, shape index: {}]   ;;  %s220_s1 = inlined_call_operand.vmem [shape: f32[64,32], index: 1, kind: input, shape index: {}]   ;;  %s221_s2 = inlined_call_operand.vmem [shape: f32[1,32], index: 2, kind: input, shape index: {}]   ;;  %s222_s3 = inlined_call_operand.vmem [shape: f32[32,16], index: 3, kind: input, shape index: {}]   ;;  %s223_s4 = inlined_call_operand.vmem [shape: f32[1,16], index: 4, kind: input, shape index: {}]   ;;  %s224_s5 = inlined_call_operand.hbm [shape: f32[8,16], index: 5, kind: output, shape index: {}]  }
   0x1   :  { %v29_v0 = vld [vmem:[%s220_s1 + $0x38] sm:$0xff]  ;;  %v28_v1 = vld [vmem:[%s220_s1 + $0x30] sm:$0xff]  ;;  %v27_v2 = vld [vmem:[%s220_s1 + $0x28] sm:$0xff] }
   0x2   :  { %51 = vmatpush.msra.mxu0 %v29_v0  ;;  %v34_v3 = vld [vmem:[%s222_s3 + $0x18] sm:$0xff]  ;;  %v26_v4 = vld [vmem:[%s220_s1 + $0x20] sm:$0xff] }
   0x3   :  { %83 = vmatpush.msra.mxu1 %v34_v3 }
   0x4   :  { %52 = vmatpush.msra.mxu0 %v28_v1 }
   0x5   :  { %10 = vsyncpa [#allocation3], 0  ;;  %v25_v5 = vld [vmem:[%s220_s1 + $0x18] sm:$0xff]  ;;  %v24_v6 = vld [vmem:[%s220_s1 + $0x10] sm:$0xff]  ;;  %vm39_vm0 = vcmask 523264   ;;  %vm67_vm1 = vcmask 261120  }
   0x6   :  { %53 = vmatpush.msra.mxu0 %v27_v2  ;;  %v23_v7 = vld [vmem:[%s220_s1 + $0x8] sm:$0xff]  ;;  %v22_v8 = vld [vmem:[%s220_s1] sm:$0xff]  ;;  %v33_v10 = vld [vmem:[%s222_s3 + $0x10] sm:$0xff]  ;;  %s140_s21 = smov [#allocation2]   ;;  %vm91_vm2 = vcmask 130048  }
   0x7   :  { %v21_v9 = vld [vmem:[%s219_s0] sm:$0xff]  ;;  %84 = vmatpush.msra.mxu1 %v33_v10  ;;  %v32_v11 = vld [vmem:[%s222_s3 + $0x8] sm:$0xff]  ;;  %s98_s22 = sshll.u32 %s140_s21, 4  ;;  %s99_s22 = int_to_ptr.vmem [resolvable:$true] %s98_s22 }
   0x8   :  { %54 = vmatpush.msra.mxu0 %v26_v4  ;;  %v31_v12 = vld [vmem:[%s222_s3] sm:$0xff]  ;;  %s100_s3 = sshll.u32 %s224_s5, 4  ;;  %s101_s3 = int_to_ptr.hbm [resolvable:$true] %s100_s3 }
   0x9   :  { %85 = vmatpush.msra.mxu1 %v32_v11  ;;  %v112_v13 = vld [vmem:[%s221_s2] ss:$0 sm:$0xff] }
   0xa   :  { %55 = vmatpush.msra.mxu0 %v25_v5  ;;  %v113_v17 = vld [vmem:[%s223_s4] ss:$0 sm:$0xff] }
   0xb   :  { %86 = vmatpush.msra.mxu1 %v31_v12 }
   0xc   :  { %56 = vmatpush.msra.mxu0 %v24_v6 }
   0xe   :  { %57 = vmatpush.msra.mxu0 %v23_v7 }
  0x10   :  { %58 = vmatpush.msra.mxu0 %v22_v8 }
  0x11   :  { %109 = vmatmul.msk.f32.vlgmr.msra.gmra.mxu0 %vm39_vm0, %v21_v9 }
  0x8e   :  { %v60_v14 = vpop.f32.mrf.mxu0 }
  0x8f   :  { %v61_v15 = vadd.f32 %v112_v13, %v60_v14 }
  0x91   :  { %v63_v16 = vmul.f32 %v61_v15, %v61_v15 }
  0x93   :  { %110 = vmatmul.msk.f32.vlgmr.msra.gmra.mxu1 %vm67_vm1, %v63_v16 }
 0x110   :  { %v88_v18 = vpop.f32.mrf.mxu1 }
 0x111   :  { %v89_v19 = vadd.f32 %v113_v17, %v88_v18 }
 0x113   :  { %92 = vst.msk [vmem:[#allocation2] sm:$0xff] %vm91_vm2, %v89_v19 }
 0x114   :  { %103 = dma.vmem_to_hbm [thread:$0]  %s99_s22, 128, %s101_s3, [#allocation3]  }
 0x115   :  { %138 = dma.done.wait [#allocation3], 128  }
 0x116   :  { %139 = vsyncadd [#allocation3], 4294967168 }
 0x117   :  { %108 = vsyncpa [#allocation3], 1 }

</bundles_post_ra>
